<compile_context>
chip_gen: v7x
topology: tpu7x:2x2x1
jax: 0.10.0
libtpu: 0.0.40
codegen_flags: <defaults>
</compile_context>

<pallas_src>
import jax
import jax.numpy as jnp
from jax import lax
from jax.experimental import pallas as pl
from jax.experimental.pallas import tpu as pltpu

_IN_EPS = 1e-3   # InstanceNorm2d eps
_BN_EPS = 1e-5   # BatchNorm2d eps


def _bn_stats_kernel(x_ref, out_ref):
    """Pass 1: per-channel [sum(h), sum(h^2)] of the InstanceNorm output.

    x_ref:   (nb, C, N)  nb batch elements
    out_ref: (1, C, 2)   resident partial accumulator for this grid "half"
    """
    @pl.when(pl.program_id(1) == 0)
    def _init():
        out_ref[...] = jnp.zeros_like(out_ref)

    x = x_ref[...]                                        # (nb, C, N)
    inv_n = 1.0 / x.shape[2]

    # InstanceNorm2d(eps=1e-3): centered variance (data is VMEM-resident, so
    # the second pass is ~free and avoids E[x^2]-E[x]^2 cancellation).
    mu = jnp.sum(x, axis=2, keepdims=True) * inv_n        # (nb, C, 1)
    xc = x - mu
    var = jnp.sum(xc * xc, axis=2, keepdims=True) * inv_n
    h = xc * lax.rsqrt(var + _IN_EPS)                     # (nb, C, N)

    # BN batch stats via sum(h)/sum(h^2): safe since h has per-(b,c) mean ~0.
    hs1 = jnp.sum(h, axis=2, keepdims=True)               # (nb, C, 1)
    hs2 = jnp.sum(h * h, axis=2, keepdims=True)           # (nb, C, 1)
    part = jnp.concatenate([hs1, hs2], axis=2)            # (nb, C, 2)
    total = part[0]
    for b in range(1, part.shape[0]):                     # tiny static unroll
        total = total + part[b]
    out_ref[...] += total[None, :, :]                     # (1, C, 2)


def _diff_pool_kernel(x_ref, w_ref, ss_ref, out_ref):
    """Pass 2: IN -> BN affine -> ReLU -> 1x1 conv -> softmax -> pooling.

    x_ref:   (nb, C, N)  original input block (re-used by the pooling matmul)
    w_ref:   (K, C)      1x1 conv weight (single shared tile, no B broadcast)
    ss_ref:  (C, 2)      precomputed BN [scale, shift] (gamma/beta folded in)
    out_ref: (nb, K, C)  lane-dense output block (C on lanes)
    """
    x = x_ref[...]                                        # (nb, C, N)
    inv_n = 1.0 / x.shape[2]

    # InstanceNorm2d(eps=1e-3), centered variance.
    mu = jnp.sum(x, axis=2, keepdims=True) * inv_n
    xc = x - mu
    var = jnp.sum(xc * xc, axis=2, keepdims=True) * inv_n
    h = xc * lax.rsqrt(var + _IN_EPS)                     # (nb, C, N)

    # BatchNorm (training-mode batch stats folded with affine) + ReLU.
    ss = ss_ref[...]                                      # (C, 2)
    h = jnp.maximum(h * ss[:, 0:1][None] + ss[:, 1:2][None], 0.0)

    # bf16 conv-matmul operands (MXU-native on all gens), f32 accumulation.
    # Numerically safe: the softmax over N that follows washes out the
    # bf16-scale noise; the pooling matmul below stays f32.
    w_bf = w_ref[...].astype(jnp.bfloat16)                # (K, C)
    h_bf = h.astype(jnp.bfloat16)                         # (nb, C, N)

    # Conv bias dropped: constant per row over N -> cancels exactly in softmax.
    for b in range(x.shape[0]):                           # small static unroll
        e = jnp.dot(w_bf, h_bf[b], preferred_element_type=jnp.float32)  # (K, N)
        e = jnp.exp(e - jnp.max(e, axis=1, keepdims=True))
        d = jnp.sum(e, axis=1, keepdims=True)             # (K, 1)
        r = pl.reciprocal(d, approx=True)                 # EUP seed
        r = r * (2.0 - d * r)                             # 1 Newton step -> ~f32
        # Pool with the UNNORMALIZED exp, then scale the small (K, C) result:
        # K*C multiplies instead of K*N, and no (K, N) normalized temporary.
        pooled = lax.dot_general(
            e, x[b], dimension_numbers=(((1,), (1,)), ((), ())),
            preferred_element_type=jnp.float32)           # (K, C)
        # TODO(synk): when K < C, dot_general(x[b], e) transposes the smaller
        # operand on the XLU and emits (C, K) directly; NCMNet has K~500 >
        # C=128, so keep (K, C).  Confirm with a bundle dump (vxpose count).
        out_ref[b] = pooled * r


def _pick_block_batches(count, bytes_per_batch, budget_bytes=4 << 20):
    """Largest nb in {16,8,4,2,1} dividing `count` whose x tile fits budget."""
    for cand in (16, 8, 4, 2, 1):
        if count % cand == 0 and cand * bytes_per_batch <= budget_bytes:
            return cand
    return 1


def diff_pool_forward(x, conv_w, conv_b, bn_gamma, bn_beta):
    """x: (B, C, N, 1); conv_w: (K, C, 1, 1); conv_b: (K,); bn_*: (C,).
    Returns (B, C, K, 1), matching the PyTorch module (training-mode BN)."""
    del conv_b  # constant over N per conv row -> cancels in softmax(dim=2)
    B, C, N, _ = x.shape
    K = conv_w.shape[0]

    # TODO(synk): if upstream x is bf16, pass it through unconverted and upcast
    # tiles in VMEM; this f32 copy doubles the HBM read traffic of both passes.
    x3 = x[..., 0].astype(jnp.float32)                    # (B, C, N)
    w2 = conv_w[:, :, 0, 0].astype(jnp.float32)           # (K, C)
    gamma = bn_gamma.astype(jnp.float32)                  # (C,)
    beta = bn_beta.astype(jnp.float32)                    # (C,)

    # Blocking: nb batches per grid step amortizes the ~0.35us/step overhead
    # and enlarges DMAs toward the HBM roofline; the 4 MiB x-tile budget keeps
    # the pass-2 working set (double-buffered x + h f32/bf16 + (K,N) temps)
    # comfortably inside v7x's 64 MiB physical / the 40 MiB scoped limit below.
    n_split = 2 if (B % 2 == 0 and B >= 2) else 1         # v7x: one half per TC
    per_split = B // n_split
    batch_bytes = C * N * 4
    nb1 = _pick_block_batches(per_split, batch_bytes)
    nb2 = _pick_block_batches(B, batch_bytes)
    steps1 = per_split // nb1

    cparams1 = pltpu.CompilerParams(
        dimension_semantics=("parallel", "arbitrary"),
        vmem_limit_bytes=40 << 20)
    cparams2 = pltpu.CompilerParams(
        dimension_semantics=("parallel",),
        vmem_limit_bytes=40 << 20)

    # Pass 1: raw per-channel [sum(h), sum(h^2)] partials.  Leading "parallel"
    # axis lets v7x's two TensorCores split the reduction; on v5e/v6e it is a
    # no-op.  TODO(synk): if xprof shows exposed DMA, try pl.Buffered(3) on x.
    partial = pl.pallas_call(
        _bn_stats_kernel,
        out_shape=jax.ShapeDtypeStruct((n_split, C, 2), jnp.float32),
        grid=(n_split, steps1),
        in_specs=[pl.BlockSpec((nb1, C, N),
                               lambda p, s: (p * steps1 + s, 0, 0))],
        out_specs=pl.BlockSpec((1, C, 2), lambda p, s: (p, 0, 0)),
        compiler_params=cparams1,
    )(x3)

    # BN finalize (scale/shift with gamma/beta folded) in plain XLA: O(C),
    # keeps the hot grid loop free of cold branches and lane-sparse operands.
    sums = jnp.sum(partial, axis=0)                       # (C, 2)
    inv_cnt = 1.0 / (B * N)
    mu_b = sums[:, 0] * inv_cnt
    var_b = sums[:, 1] * inv_cnt - mu_b * mu_b            # biased variance
    scale = gamma * lax.rsqrt(var_b + _BN_EPS)
    shift = beta - mu_b * scale
    ss = jnp.stack([scale, shift], axis=1)                # (C, 2)

    # Pass 2: fused per-batch-block forward, fully parallel over the grid.
    # TODO(synk): for very large N (>~8K on v7x, ~16K on v5e/v6e at K~500)
    # tile N with an online-softmax accumulator; NCMNet's N~2000 fits easily.
    out_bkc = pl.pallas_call(
        _diff_pool_kernel,
        out_shape=jax.ShapeDtypeStruct((B, K, C), jnp.float32),
        grid=(B // nb2,),
        in_specs=[
            pl.BlockSpec((nb2, C, N), lambda i: (i, 0, 0)),
            pl.BlockSpec((K, C), lambda i: (0, 0)),
            pl.BlockSpec((C, 2), lambda i: (0, 0)),
        ],
        out_specs=pl.BlockSpec((nb2, K, C), lambda i: (i, 0, 0)),
        compiler_params=cparams2,
    )(x3, w2, ss)

    # Tiny layout fixup outside the kernel: (B, K, C) -> (B, C, K, 1).
    return jnp.transpose(out_bkc, (0, 2, 1))[..., None]


def _reference_forward(x, conv_w, conv_b, bn_gamma, bn_beta):
    """Pure-jnp reference mirroring the PyTorch forward (training-mode BN)."""
    x3 = x[..., 0].astype(jnp.float32)
    mu_i = x3.mean(axis=2, keepdims=True)
    var_i = ((x3 - mu_i) ** 2).mean(axis=2, keepdims=True)
    h = (x3 - mu_i) / jnp.sqrt(var_i + _IN_EPS)
    mu_b = h.mean(axis=(0, 2), keepdims=True)
    var_b = ((h - mu_b) ** 2).mean(axis=(0, 2), keepdims=True)
    h = (h - mu_b) / jnp.sqrt(var_b + _BN_EPS)
    h = h * bn_gamma.reshape(1, -1, 1) + bn_beta.reshape(1, -1, 1)
    h = jnp.maximum(h, 0.0)
    embed = jnp.einsum('kc,bcn->bkn', conv_w[:, :, 0, 0], h) + conv_b.reshape(1, -1, 1)
    s = jax.nn.softmax(embed, axis=2)
    out = jnp.einsum('bcn,bkn->bck', x3, s)
    return out[..., None]


def _reference_kernel_numerics(x, conv_w, bn_gamma, bn_beta):
    """Reference mirroring the kernel's numerics (bf16 conv-matmul operands,
    bias dropped -- exact under softmax) for the strict tolerance check."""
    x3 = x[..., 0].astype(jnp.float32)
    mu_i = x3.mean(axis=2, keepdims=True)
    var_i = ((x3 - mu_i) ** 2).mean(axis=2, keepdims=True)
    h = (x3 - mu_i) / jnp.sqrt(var_i + _IN_EPS)
    mu_b = h.mean(axis=(0, 2), keepdims=True)
    var_b = ((h - mu_b) ** 2).mean(axis=(0, 2), keepdims=True)
    h = (h - mu_b) / jnp.sqrt(var_b + _BN_EPS)
    h = h * bn_gamma.reshape(1, -1, 1) + bn_beta.reshape(1, -1, 1)
    h = jnp.maximum(h, 0.0)
    w_bf = conv_w[:, :, 0, 0].astype(jnp.bfloat16).astype(jnp.float32)
    h_bf = h.astype(jnp.bfloat16).astype(jnp.float32)
    embed = jnp.einsum('kc,bcn->bkn', w_bf, h_bf)
    s = jax.nn.softmax(embed, axis=2)
    out = jnp.einsum('bcn,bkn->bck', x3, s)
    return out[..., None]


if __name__ == "__main__":
    key = jax.random.PRNGKey(0)
    B, C, N, K = 12, 32, 128, 16   # x: (B, C, N, 1), output_points = K
    kx, kw, kb, kg, kbe = jax.random.split(key, 5)

    x = jax.random.normal(kx, (B, C, N, 1), dtype=jnp.float32)
    conv_w = 0.1 * jax.random.normal(kw, (K, C, 1, 1), dtype=jnp.float32)
    conv_b = 0.1 * jax.random.normal(kb, (K,), dtype=jnp.float32)
    bn_gamma = 1.0 + 0.1 * jax.random.normal(kg, (C,), dtype=jnp.float32)
    bn_beta = 0.1 * jax.random.normal(kbe, (C,), dtype=jnp.float32)

    out = diff_pool_forward(x, conv_w, conv_b, bn_gamma, bn_beta)
    out = jax.block_until_ready(out)
    assert out.shape == (B, C, K, 1), out.shape

    # Strict check against a reference with matching (bf16-conv) numerics.
    ref_kernel = _reference_kernel_numerics(x, conv_w, bn_gamma, bn_beta)
    err = float(jnp.max(jnp.abs(out - ref_kernel)))
    assert jnp.allclose(out, ref_kernel, atol=1e-4, rtol=1e-4), err

    # Loose sanity check against the pure-f32 PyTorch-equivalent forward
    # (the only deliberate deviation is the bf16 conv matmul).
    ref_full = _reference_forward(x, conv_w, conv_b, bn_gamma, bn_beta)
    err_full = float(jnp.max(jnp.abs(out - ref_full)))
    assert jnp.allclose(out, ref_full, atol=2e-2, rtol=2e-2), err_full

    print("KERNEL_OK")
</pallas_src>

<mosaic_0001>
module attributes {stable_mosaic.version = 11 : i64} {
  func.func @_bn_stats_kernel(%arg0: i32, %arg1: i32, %arg2: memref<2x32x128xf32, #tpu.memory_space<vmem>>, %arg3: memref<1x32x2xf32, #tpu.memory_space<vmem>>) attributes {dimension_semantics = [#tpu.dimension_semantics<parallel>, #tpu.dimension_semantics<arbitrary>], iteration_bounds = array<i64: 2, 3>, scalar_prefetch = 0 : i64, scratch_operands = 0 : i64, tpu.core_type = #tpu.core_type<tc>, window_params = [{transform_indices = @transform_0, window_bounds = array<i64: 2, 32, 128>}, {transform_indices = @transform_1, window_bounds = array<i64: 1, 32, 2>}]} {
    %c0_i32 = arith.constant 0 : i32
    %0 = arith.cmpi eq, %arg1, %c0_i32 : i32
    %1 = arith.extui %0 : i1 to i32
    %c0_i32_0 = arith.constant 0 : i32
    %2 = arith.cmpi ne, %1, %c0_i32_0 : i32
    scf.if %2 {
      %cst_15 = arith.constant 0.000000e+00 : f32
      %35 = vector.broadcast %cst_15 : f32 to vector<1x32x2xf32>
      %c0_16 = arith.constant 0 : index
      %c0_17 = arith.constant 0 : index
      %c0_18 = arith.constant 0 : index
      %36 = vector.load %arg3[%c0_16, %c0_17, %c0_18] : memref<1x32x2xf32, #tpu.memory_space<vmem>>, vector<1x32x2xf32>
      tpu.vector_store %arg3[%c0_16, %c0_17, %c0_18], %35 {strides = array<i32>} : memref<1x32x2xf32, #tpu.memory_space<vmem>>, vector<1x32x2xf32>,
    } else {
    }
    %c0 = arith.constant 0 : index
    %c0_1 = arith.constant 0 : index
    %c0_2 = arith.constant 0 : index
    %3 = vector.load %arg2[%c0, %c0_1, %c0_2] : memref<2x32x128xf32, #tpu.memory_space<vmem>>, vector<2x32x128xf32>
    %cst = arith.constant dense<0.000000e+00> : vector<2x32xf32>
    %4 = vector.multi_reduction <add>, %3, %cst [2] : vector<2x32x128xf32> to vector<2x32xf32>
    %5 = vector.shape_cast %4 : vector<2x32xf32> to vector<2x32x1xf32>
    %cst_3 = arith.constant 7.812500e-03 : f32
    %6 = vector.broadcast %cst_3 : f32 to vector<2x32x1xf32>
    %7 = arith.mulf %5, %6 : vector<2x32x1xf32>
    %8 = vector.broadcast %7 : vector<2x32x1xf32> to vector<2x32x128xf32>
    %9 = arith.subf %3, %8 : vector<2x32x128xf32>
    %10 = arith.mulf %9, %9 : vector<2x32x128xf32>
    %cst_4 = arith.constant dense<0.000000e+00> : vector<2x32xf32>
    %11 = vector.multi_reduction <add>, %10, %cst_4 [2] : vector<2x32x128xf32> to vector<2x32xf32>
    %12 = vector.shape_cast %11 : vector<2x32xf32> to vector<2x32x1xf32>
    %cst_5 = arith.constant 7.812500e-03 : f32
    %13 = vector.broadcast %cst_5 : f32 to vector<2x32x1xf32>
    %14 = arith.mulf %12, %13 : vector<2x32x1xf32>
    %cst_6 = arith.constant 1.000000e-03 : f32
    %15 = vector.broadcast %cst_6 : f32 to vector<2x32x1xf32>
    %16 = arith.addf %14, %15 : vector<2x32x1xf32>
    %17 = math.rsqrt %16 : vector<2x32x1xf32>
    %18 = vector.broadcast %17 : vector<2x32x1xf32> to vector<2x32x128xf32>
    %19 = arith.mulf %9, %18 : vector<2x32x128xf32>
    %cst_7 = arith.constant dense<0.000000e+00> : vector<2x32xf32>
    %20 = vector.multi_reduction <add>, %19, %cst_7 [2] : vector<2x32x128xf32> to vector<2x32xf32>
    %21 = vector.shape_cast %20 : vector<2x32xf32> to vector<2x32x1xf32>
    %22 = arith.mulf %19, %19 : vector<2x32x128xf32>
    %cst_8 = arith.constant dense<0.000000e+00> : vector<2x32xf32>
    %23 = vector.multi_reduction <add>, %22, %cst_8 [2] : vector<2x32x128xf32> to vector<2x32xf32>
    %24 = vector.shape_cast %23 : vector<2x32xf32> to vector<2x32x1xf32>
    %25 = tpu.concatenate %21, %24 in 2 : vector<2x32x1xf32>, vector<2x32x1xf32> -> vector<2x32x2xf32>
    %26 = vector.extract_strided_slice %25 {offsets = [0, 0, 0], sizes = [1, 32, 2], strides = [1, 1, 1]} : vector<2x32x2xf32> to vector<1x32x2xf32>
    %27 = vector.shape_cast %26 : vector<1x32x2xf32> to vector<32x2xf32>
    %28 = vector.extract_strided_slice %25 {offsets = [1, 0, 0], sizes = [1, 32, 2], strides = [1, 1, 1]} : vector<2x32x2xf32> to vector<1x32x2xf32>
    %29 = vector.shape_cast %28 : vector<1x32x2xf32> to vector<32x2xf32>
    %30 = arith.addf %27, %29 : vector<32x2xf32>
    %c0_9 = arith.constant 0 : index
    %c0_10 = arith.constant 0 : index
    %c0_11 = arith.constant 0 : index
    %31 = vector.load %arg3[%c0_9, %c0_10, %c0_11] : memref<1x32x2xf32, #tpu.memory_space<vmem>>, vector<1x32x2xf32>
    %32 = vector.shape_cast %30 : vector<32x2xf32> to vector<1x32x2xf32>
    %33 = arith.addf %31, %32 : vector<1x32x2xf32>
    %c0_12 = arith.constant 0 : index
    %c0_13 = arith.constant 0 : index
    %c0_14 = arith.constant 0 : index
    %34 = vector.load %arg3[%c0_12, %c0_13, %c0_14] : memref<1x32x2xf32, #tpu.memory_space<vmem>>, vector<1x32x2xf32>
    tpu.vector_store %arg3[%c0_12, %c0_13, %c0_14], %33 {strides = array<i32>} : memref<1x32x2xf32, #tpu.memory_space<vmem>>, vector<1x32x2xf32>,
    return
  }
  func.func @transform_0(%arg0: i32, %arg1: i32) -> (i32, i32, i32) {
    %c3_i32 = arith.constant 3 : i32
    %0 = arith.muli %arg0, %c3_i32 : i32
    %1 = arith.addi %0, %arg1 : i32
    %c0_i32 = arith.constant 0 : i32
    %c0_i32_0 = arith.constant 0 : i32
    %c0_i32_1 = arith.constant 0 : i32
    return %1, %c0_i32, %c0_i32_0 : i32, i32, i32
  }
  func.func @transform_1(%arg0: i32, %arg1: i32) -> (i32, i32, i32) {
    %c0_i32 = arith.constant 0 : i32
    %c0_i32_0 = arith.constant 0 : i32
    %c0_i32_1 = arith.constant 0 : i32
    return %arg0, %c0_i32, %c0_i32_0 : i32, i32, i32
  }
}

</mosaic_0001>

<bundles_post_ra>
// kernel: tpu_custom_call.1
= control target key start
LH: loop header
LB: loop body
LE: loop exit
PB: predicated region body
PF: predicated region fallthrough
CT: control target
= control target key end

     0   :  { %6 = vsyncpa [#allocation3], 0  ;;  %s836_s0 = inlined_call_operand.hbm [shape: f32[12,32,128], index: 0, kind: input, shape index: {}]   ;;  %s837_s1 = inlined_call_operand.vmem [shape: f32[2,32,2], index: 1, kind: output, shape index: {}]  }
   0x1   :  { %8 = vsyncpa [#allocation3 + $0x1], 0  ;;  %s630_s6 = smov 0   ;;  %s632_s7 = smov 0  }
   0x2   :  { %s634_s8 = smov 0   ;;  %s636_s9 = smov 0  }
   0x3   :  { %s638_s10 = smov 0   ;;  %s640_s11 = smov 0  }
   0x4   :  { %s642_s12 = smov 0   ;;  %s644_s13 = smov 0  }
   0x5 LB: > { %s410_s14 = sadd.s32 4294967295, %s614_s13   ;;  %s23_s15 = sadd.s32 1, %s606_s11  ;;  %s614_s13 = sphi %s644_s13, %s14_s13   ;;  %s610_s12 = sphi %s642_s12, %s849_s12   ;;  %s606_s11 = sphi %s640_s11, %s848_s11   ;;  %s602_s10 = sphi %s638_s10, %s847_s10   ;;  %s598_s9 = sphi %s636_s9, %s846_s9   ;;  %s594_s8 = sphi %s634_s8, %s845_s8   ;;  %s590_s7 = sphi %s632_s7, %s844_s7   ;;  %s586_s6 = sphi %s630_s6, %s843_s6  }
   0x6   : > { %p24_p0 = scmp.ge.s32.totalorder %s23_s15, 3  ;;  %s26_s16 = sadd.s32 1, %s610_s12 }
   0x7   : > { %s30_s17 = smul.u32 3, %s610_s12  ;;  %s37_s18 = sadd.s32 1, %s594_s8 }
   0x8   : > { %s851_s15 = smov (%p24_p0, %s23_s15), 0  ;;  %s853_s16 = smov (!%p24_p0, %s26_s16), %s610_s12 }
   0x9   : > { %s31_s19 = sadd.s32 %s606_s11, %s30_s17  ;;  %p44_p1 = scmp.ne.s32.totalorder %s594_s8, %s590_s7 }
   0xa   : > { %p28_p2 = scmp.ge.s32.totalorder %s853_s16, 2  ;;  %p45_p3 = scmp.eq.s32.totalorder %s614_s13, 0 }
   0xb   : > { %p50_p4 = scmp.ne.s32.totalorder %s590_s7, %s586_s6  ;;  %p51_p5 = scmp.eq.s32.totalorder %s410_s14, 0 }
   0xc   : > { %s855_s16 = smov (%p28_p2, %s853_s16), 0  ;;  %p683_p6 = por %p45_p3, %p44_p1 }
   0xd   : > { %p687_p7 = por %p51_p5, %p50_p4  ;;  %s32_s22 = smul.u32 3, %s855_s16 }
   0xe   : > { %p434_p8 = scmp.lt.s32.totalorder %s614_s13, 6  ;;  %s100_s23 = sand.u32 1, %s594_s8  }
   0xf   : > { %s33_s24 = sadd.s32 %s32_s22, %s851_s15  ;;  %s414_s26 = sshll.u32 %s100_s23, 6 }
  0x10   : > { %s34_s25 = ssub.s32 %s31_s19, %s33_s24  ;;  %s426_s27 = sshll.u32 %s31_s19, 10 }
  0x11   : > { %p35_p9 = scmp.eq.s32.totalorder %s34_s25, 0  ;;  %s104_s28 = scalar_lea.vmem [#allocation2], %s414_s26 }
  0x12   : > { %s114_s29 = sshll.u32 %s104_s28, 4  ;;  %s701_s4 = scalar_lea.hbm %s836_s0, %s426_s27  ;;  %s703_s29 = int_to_ptr.vmem [resolvable:$true] %s114_s29 }
  0x13   : > { %s696_s30 = scalar_select %p35_p9, %s594_s8, %s37_s18  }
  0x14   : > { %p707_p10 = pnand %p434_p8, %p683_p6  ;;  %s713_s6 = scalar_lea.sflag [#allocation3], %s100_s23 }
  0x15   : > { %s518_s14 = scalar_lea.hbm %s701_s4, 1024  ;;  %s523_s19 = scalar_lea.hbm %s836_s0, 6144 }
  0x16   : > { %p519_p13 = scmp.ne.s32.totalorder %s701_s4, %s518_s14  ;;  %p520_p0 = pneg %p707_p10 }
  0x17   : > { %p524_p3 = scmp.lt.u32.totalorder %s701_s4, %s836_s0  ;;  %p525_p4 = scmp.lt.u32.totalorder %s523_s19, %s518_s14 }
  0x18   : > { %p521_p1 = pnand %p520_p0, %p519_p13  ;;  %p527_p6 = scmp.lt.u32.totalorder %s518_s14, %s701_s4 }
  0x19   : > { %p526_p5 = por %p525_p4, %p524_p3 }
  0x1a   : > { %p522_p2 = pneg %p521_p1 }
  0x1b   : > { %p528_p8 = por %p527_p6, %p526_p5 }
  0x1d   : > { %p529_p9 = pnand %p528_p8, %p522_p2 }
  0x1f   : > { %532 = shalt.err (!%p529_p9)
}
  0x20   : > { %s533_s23 = scalar_lea.vmem %s703_s29, 1024  ;;  %s616_s24 = smov [#allocation2]  }
  0x21   : > { %p534_p13 = scmp.ne.s32.totalorder %s703_s29, %s533_s23  ;;  %s538_s25 = sshll.u32 %s616_s24, 4  ;;  %s539_s25 = int_to_ptr.vmem [resolvable:$false] %s538_s25 }
  0x22   : > { %s540_s26 = scalar_lea.vmem %s539_s25, 2048  ;;  %p541_p12 = scmp.lt.s32.totalorder %s703_s29, %s539_s25 }
  0x23   : > { %p536_p1 = pnand %p534_p13, %p520_p0  ;;  %p542_p3 = scmp.lt.s32.totalorder %s540_s26, %s533_s23 }
  0x25   : > { %p537_p11 = pneg %p536_p1  ;;  %p543_p4 = por %p542_p3, %p541_p12 }
  0x27   : > { %p544_p5 = pnand %p543_p4, %p537_p11 }
  0x29   : > { %547 = shalt.err (!%p544_p5)
}
  0x2a   : > { %s617_s27 = smov 128   ;;  %s618_s28 = smov 8  }
  0x2b   : > { %433 = dma.hbm_to_vmem [thread:$0]  (!%p707_p10), %s701_s4, 1024, %s703_s29, %s713_s6, %s617_s27, %s617_s27, %s618_s28  }
  0x2c   : > { %p841_p0 = scmp.lt.s32.totalorder %s614_s13, 7  ;;  %p842_p2 = scmp.ge.s32.totalorder %s614_s13, 1 }
  0x2e   : > { %p123_p6 = pnand %p842_p2, %p841_p0 }
  0x2f   : > { %s128_s2 = sand.u32 (!%p123_p6), 1, %s590_s7  }
  0x30   : > { %126 = sbr.rel (%p123_p6) target bundleno = 553 (0x229), region = 24  ;;  %s419_s3 = sshll.u32 (!%p123_p6), %s128_s2, 6 }
  0x31   : > { %s129_s14 = scalar_lea.sflag (!%p123_p6), [#allocation3], %s128_s2  ;;  %s132_s17 = scalar_lea.vmem (!%p123_p6), [#allocation2], %s419_s3 }
  0x37   : > { %581 = dma.done.wait (%p687_p7), %s129_s14, 1024  }
  0x38   : > { %583 = vsyncadd (%p687_p7), %s129_s14, 4294966272  ;;  %p154_p11 = scmp.lt.s32.totalorder %s602_s10, 1  ;;  %p422_p10 = scmp.ne.s32.totalorder %s598_s9, 0 }
  0x39   : > { %vm163_vm0 = vcmask (!%p422_p10), 15360   ;;  %v619_v0 = vmov (!%p422_p10), 0.0  }
  0x3a   : > { %s857_s10 = smov (!%p154_p11, %s602_s10), 1  ;;  %162 = sbr.rel (%p422_p10) target bundleno = 65 (0x41), region = 32 }
  0x3b   : > { %s427_s29 = sshll.u32 %s857_s10, 5 }
  0x3c   : > { %s755_s6 = scalar_lea.vmem %s837_s1, %s427_s29 }
  0x3d   : > { %164 = vst.msk [vmem:[%s755_s6] sm:$0xff] (!%p422_p10), %vm163_vm0, %v619_v0  ;;  %165 = vst.msk [vmem:[%s755_s6 + $0x8] sm:$0xff] (!%p422_p10), %vm163_vm0, %v619_v0 }
  0x3e   : > { %166 = vst.msk [vmem:[%s755_s6 + $0x10] sm:$0xff] (!%p422_p10), %vm163_vm0, %v619_v0  ;;  %167 = vst.msk [vmem:[%s755_s6 + $0x18] sm:$0xff] (!%p422_p10), %vm163_vm0, %v619_v0 }
  0x41 PF: > { %v168_v1 = vld [vmem:[%s132_s17] sm:$0xff]  ;;  %v170_v2 = vld [vmem:[%s132_s17 + $0x10] sm:$0xff]  ;;  %v169_v3 = vld [vmem:[%s132_s17 + $0x8] sm:$0xff]  ;;  %vm304_vm1 = vcmask 7168   ;;  %vm325_vm2 = vcmask 15360  }
  0x42   : > { %176 = vadd.xlane.f32.xlu0 %v168_v1  ;;  %180 = vadd.xlane.f32.xlu1 %v170_v2  ;;  %v171_v4 = vld [vmem:[%s132_s17 + $0x18] sm:$0xff]  ;;  %v172_v5 = vld [vmem:[%s132_s17 + $0x20] sm:$0xff]  ;;  %v173_v6 = vld [vmem:[%s132_s17 + $0x28] sm:$0xff] }
  0x43   : > { %v174_v7 = vld [vmem:[%s132_s17 + $0x30] sm:$0xff]  ;;  %v175_v8 = vld [vmem:[%s132_s17 + $0x38] sm:$0xff] }
  0x46   : > { %178 = vadd.xlane.f32.xlu0 %v169_v3  ;;  %182 = vadd.xlane.f32.xlu1 %v171_v4 }
  0x4a   : > { %184 = vadd.xlane.f32.xlu0 %v172_v5  ;;  %186 = vadd.xlane.f32.xlu1 %v173_v6 }
  0x4e   : > { %188 = vadd.xlane.f32.xlu0 %v174_v7  ;;  %190 = vadd.xlane.f32.xlu1 %v175_v8 }
  0xcf   : > { %v177_v9 = vpop.xlane.xlu0 %176  ;;  %v181_v10 = vpop.xlane.xlu1 %180 }
  0xd0   : > { %v192_v11 = vmul.f32 0.0078125, %v177_v9  ;;  %v194_v12 = vmul.f32 0.0078125, %v181_v10 }
  0xd2   : > { %v762_v13 = vsub.f32 %v168_v1, %v192_v11  ;;  %v764_v14 = vsub.f32 %v170_v2, %v194_v12 }
  0xd3   : > { %v179_v15 = vpop.xlane.xlu0 %178  ;;  %v183_v16 = vpop.xlane.xlu1 %182 }
  0xd4   : > { %v193_v17 = vmul.f32 0.0078125, %v179_v15  ;;  %v208_v18 = vmul.f32 %v762_v13, %v762_v13  ;;  %v195_v19 = vmul.f32 0.0078125, %v183_v16  ;;  %v210_v22 = vmul.f32 %v764_v14, %v764_v14 }
  0xd6   : > { %v768_v20 = vsub.f32 %v169_v3, %v193_v17  ;;  %216 = vadd.xlane.f32.xlu0 %v208_v18  ;;  %v770_v21 = vsub.f32 %v171_v4, %v195_v19 }
  0xd7   : > { %v185_v23 = vpop.xlane.xlu0 %184  ;;  %v187_v24 = vpop.xlane.xlu1 %186 }
  0xd8   : > { %v196_v25 = vmul.f32 0.0078125, %v185_v23  ;;  %v209_v26 = vmul.f32 %v768_v20, %v768_v20  ;;  %v197_v27 = vmul.f32 0.0078125, %v187_v24  ;;  %v211_v30 = vmul.f32 %v770_v21, %v770_v21 }
  0xda   : > { %v776_v28 = vsub.f32 %v172_v5, %v196_v25  ;;  %220 = vadd.xlane.f32.xlu0 %v210_v22  ;;  %218 = vadd.xlane.f32.xlu1 %v209_v26  ;;  %v778_v29 = vsub.f32 %v173_v6, %v197_v27 }
  0xdb   : > { %v189_v31 = vpop.xlane.xlu0 %188  ;;  %v191_v32 = vpop.xlane.xlu1 %190 }
  0xdc   : > { %v198_v33 = vmul.f32 0.0078125, %v189_v31  ;;  %v212_v34 = vmul.f32 %v776_v28, %v776_v28  ;;  %v199_v35 = vmul.f32 0.0078125, %v191_v32  ;;  %v213_v38 = vmul.f32 %v778_v29, %v778_v29 }
  0xde   : > { %v206_v36 = vsub.f32 %v174_v7, %v198_v33  ;;  %222 = vadd.xlane.f32.xlu1 %v211_v30  ;;  %224 = vadd.xlane.f32.xlu0 %v212_v34  ;;  %v207_v37 = vsub.f32 %v175_v8, %v199_v35 }
  0xe0   : > { %v214_v39 = vmul.f32 %v206_v36, %v206_v36  ;;  %v215_v40 = vmul.f32 %v207_v37, %v207_v37 }
  0xe2   : > { %226 = vadd.xlane.f32.xlu1 %v213_v38  ;;  %228 = vadd.xlane.f32.xlu0 %v214_v39  ;;  %v317_v39 = vld [vmem:[%s755_s6] sm:$0xff] }
  0xe6   : > { %230 = vadd.xlane.f32.xlu1 %v215_v40 }
 0x163   : > { %v217_v41 = vpop.xlane.xlu0 %216 }
 0x164   : > { %v232_v42 = vmul.f32 0.0078125, %v217_v41 }
 0x166   : > { %v240_v43 = vadd.f32 0.001, %v232_v42 }
 0x167   : > { %v219_v44 = vpop.xlane.xlu1 %218  ;;  %v221_v45 = vpop.xlane.xlu0 %220 }
 0x168   : > { %502 = vrsqrt.f32 %v240_v43  ;;  %v233_v46 = vmul.f32 0.0078125, %v219_v44  ;;  %v234_v47 = vmul.f32 0.0078125, %v221_v45  ;;  %v318_v45 = vld [vmem:[%s755_s6 + $0x8] sm:$0xff] }
 0x16a   : > { %v241_v48 = vadd.f32 0.001, %v233_v46  ;;  %v242_v49 = vadd.f32 0.001, %v234_v47 }
 0x16b   : > { %v223_v50 = vpop.xlane.xlu1 %222  ;;  %v225_v51 = vpop.xlane.xlu0 %224 }
 0x16c   : > { %504 = vrsqrt.f32 %v241_v48  ;;  %v235_v52 = vmul.f32 0.0078125, %v223_v50  ;;  %v236_v53 = vmul.f32 0.0078125, %v225_v51  ;;  %v319_v50 = vld [vmem:[%s755_s6 + $0x10] sm:$0xff] }
 0x16d   : > { %506 = vrsqrt.f32 %v242_v49 }
 0x16e   : > { %v243_v54 = vadd.f32 0.001, %v235_v52  ;;  %v244_v55 = vadd.f32 0.001, %v236_v53 }
 0x16f   : > { %v227_v56 = vpop.xlane.xlu1 %226  ;;  %v229_v57 = vpop.xlane.xlu0 %228 }
 0x170   : > { %508 = vrsqrt.f32 %v243_v54  ;;  %v237_v58 = vmul.f32 0.0078125, %v227_v56  ;;  %v238_v59 = vmul.f32 0.0078125, %v229_v57  ;;  %v320_v57 = vld [vmem:[%s755_s6 + $0x18] sm:$0xff] }
 0x171   : > { %510 = vrsqrt.f32 %v244_v55 }
 0x172   : > { %v503_v60 = vpop.eup %502  ;;  %v245_v61 = vadd.f32 0.001, %v237_v58  ;;  %v246_v62 = vadd.f32 0.001, %v238_v59 }
 0x173   : > { %v231_v63 = vpop.xlane.xlu1 %230  ;;  %v256_v0 = vmul.f32 %v503_v60, %v762_v13 }
 0x174   : > { %512 = vrsqrt.f32 %v245_v61  ;;  %v239_v1 = vmul.f32 0.0078125, %v231_v63 }
 0x175   : > { %514 = vrsqrt.f32 %v246_v62  ;;  %264 = vadd.xlane.f32.xlu0 %v256_v0 }
 0x176   : > { %v505_v2 = vpop.eup %504  ;;  %v247_v3 = vadd.f32 0.001, %v239_v1 }
 0x177   : > { %v507_v4 = vpop.eup %506  ;;  %v257_v5 = vmul.f32 %v505_v2, %v768_v20 }
 0x178   : > { %516 = vrsqrt.f32 %v247_v3  ;;  %v258_v6 = vmul.f32 %v507_v4, %v764_v14  ;;  %v280_v14 = vmul.f32 %v256_v0, %v256_v0 }
 0x179   : > { %266 = vadd.xlane.f32.xlu1 %v257_v5  ;;  %v281_v18 = vmul.f32 %v257_v5, %v257_v5 }
 0x17a   : > { %v509_v7 = vpop.eup %508  ;;  %268 = vadd.xlane.f32.xlu0 %v258_v6  ;;  %v282_v19 = vmul.f32 %v258_v6, %v258_v6 }
 0x17b   : > { %v511_v8 = vpop.eup %510  ;;  %v259_v9 = vmul.f32 %v509_v7, %v770_v21 }
 0x17c   : > { %v260_v10 = vmul.f32 %v511_v8, %v776_v28 }
 0x17d   : > { %270 = vadd.xlane.f32.xlu1 %v259_v9  ;;  %v283_v20 = vmul.f32 %v259_v9, %v259_v9 }
 0x17e   : > { %v513_v11 = vpop.eup %512  ;;  %272 = vadd.xlane.f32.xlu0 %v260_v10  ;;  %v284_v21 = vmul.f32 %v260_v10, %v260_v10 }
 0x17f   : > { %v515_v12 = vpop.eup %514  ;;  %v261_v13 = vmul.f32 %v513_v11, %v778_v29 }
 0x180   : > { %v262_v15 = vmul.f32 %v515_v12, %v206_v36 }
 0x181   : > { %274 = vadd.xlane.f32.xlu1 %v261_v13  ;;  %v285_v22 = vmul.f32 %v261_v13, %v261_v13 }
 0x182   : > { %v517_v16 = vpop.eup %516  ;;  %276 = vadd.xlane.f32.xlu0 %v262_v15  ;;  %v286_v23 = vmul.f32 %v262_v15, %v262_v15 }
 0x183   : > { %v263_v17 = vmul.f32 %v517_v16, %v207_v37 }
 0x185   : > { %278 = vadd.xlane.f32.xlu1 %v263_v17  ;;  %v287_v24 = vmul.f32 %v263_v17, %v263_v17 }
 0x186   : > { %288 = vadd.xlane.f32.xlu0 %v280_v14 }
 0x189   : > { %290 = vadd.xlane.f32.xlu1 %v281_v18 }
 0x18a   : > { %292 = vadd.xlane.f32.xlu0 %v282_v19 }
 0x18d   : > { %294 = vadd.xlane.f32.xlu1 %v283_v20 }
 0x18e   : > { %296 = vadd.xlane.f32.xlu0 %v284_v21 }
 0x191   : > { %298 = vadd.xlane.f32.xlu1 %v285_v22 }
 0x192   : > { %300 = vadd.xlane.f32.xlu0 %v286_v23 }
 0x195   : > { %302 = vadd.xlane.f32.xlu1 %v287_v24 }
 0x202   : > { %v265_v25 = vpop.xlane.xlu0 %264 }
 0x206   : > { %v267_v26 = vpop.xlane.xlu1 %266 }
 0x207   : > { %v269_v27 = vpop.xlane.xlu0 %268 }
 0x20a   : > { %v271_v28 = vpop.xlane.xlu1 %270 }
 0x20b   : > { %v273_v29 = vpop.xlane.xlu0 %272 }
 0x20e   : > { %v275_v30 = vpop.xlane.xlu1 %274 }
 0x20f   : > { %v277_v31 = vpop.xlane.xlu0 %276 }
 0x212   : > { %v279_v32 = vpop.xlane.xlu1 %278 }
 0x213   : > { %v289_v33 = vpop.xlane.xlu0 %288 }
 0x214   : > { %v305_v38 = vsel %vm304_vm1, %v265_v25, %v289_v33 }
 0x216   : > { %v291_v34 = vpop.xlane.xlu1 %290 }
 0x217   : > { %v293_v35 = vpop.xlane.xlu0 %292  ;;  %v306_v43 = vsel %vm304_vm1, %v267_v26, %v291_v34 }
 0x218   : > { %v307_v48 = vsel %vm304_vm1, %v269_v27, %v293_v35 }
 0x21a   : > { %v295_v36 = vpop.xlane.xlu1 %294 }
 0x21b   : > { %v297_v37 = vpop.xlane.xlu0 %296  ;;  %v308_v55 = vsel %vm304_vm1, %v271_v28, %v295_v36 }
 0x21c   : > { %v309_v40 = vsel %vm304_vm1, %v273_v29, %v297_v37 }
 0x21d   : > { %v313_v41 = vadd.f32 %v309_v40, %v305_v38 }
 0x21e   : > { %v299_v42 = vpop.xlane.xlu1 %298 }
 0x21f   : > { %v321_v44 = vadd.f32 %v317_v39, %v313_v41  ;;  %v310_v46 = vsel %vm304_vm1, %v275_v30, %v299_v42  ;;  %v301_v47 = vpop.xlane.xlu0 %300 }
 0x220   : > { %v314_v49 = vadd.f32 %v310_v46, %v306_v43  ;;  %v311_v51 = vsel %vm304_vm1, %v277_v31, %v301_v47 }
 0x221   : > { %326 = vst.msk [vmem:[%s755_s6] sm:$0xff] %vm325_vm2, %v321_v44  ;;  %v315_v52 = vadd.f32 %v311_v51, %v307_v48 }
 0x222   : > { %v322_v53 = vadd.f32 %v318_v45, %v314_v49  ;;  %v303_v54 = vpop.xlane.xlu1 %302 }
 0x223   : > { %v323_v56 = vadd.f32 %v319_v50, %v315_v52  ;;  %v312_v58 = vsel %vm304_vm1, %v279_v32, %v303_v54 }
 0x224   : > { %327 = vst.msk [vmem:[%s755_s6 + $0x8] sm:$0xff] %vm325_vm2, %v322_v53  ;;  %v316_v59 = vadd.f32 %v312_v58, %v308_v55 }
 0x225   : > { %328 = vst.msk [vmem:[%s755_s6 + $0x10] sm:$0xff] %vm325_vm2, %v323_v56 }
 0x226   : > { %v324_v60 = vadd.f32 %v320_v57, %v316_v59 }
 0x228   : > { %329 = vst.msk [vmem:[%s755_s6 + $0x18] sm:$0xff] %vm325_vm2, %v324_v60 }
 0x229 PF: > { %s14_s13 = sadd.s32 1, %s614_s13   ;;  %s843_s6 = smov %s590_s7 }
 0x22a   : > { %p11_p7 = scmp.ge.s32.totalorder %s14_s13, 8   ;;  %s844_s7 = smov %s594_s8 }
 0x22b   : > { %s845_s8 = smov %s696_s30  ;;  %s846_s9 = smov %s606_s11 }
 0x22c   : > { %s847_s10 = smov %s610_s12  ;;  %s848_s11 = smov %s851_s15 }
 0x22d   : > { %s849_s12 = smov %s855_s16  ;;  %13 = sbr.rel (!%p11_p7) target bundleno = 5 (0x5), region = 68 }
 0x234   :  { %351 = vsyncpa [#allocation3], 1 }
 0x235   :  { %353 = vsyncpa [#allocation3 + $0x1], 1 }

</bundles_post_ra>
